<compile_context>
chip_gen: v5e
topology: v5e:2x2
jax: 0.10.0
libtpu: 0.0.40
codegen_flags: <defaults>
</compile_context>

<pallas_src>
import functools

import numpy as np
import jax
import jax.numpy as jnp
from jax.experimental import pallas as pl
from jax.experimental.pallas import tpu as pltpu

HIDDEN = 64            # per-head hidden width (as in the PyTorch module)
PACKED = 2 * HIDDEN    # fused actor+critic hidden / output lane width (= 128)


def _round_up(x, m):
    return (x + m - 1) // m * m


def _cdiv(a, b):
    return -(-a // b)


def _pick_tile_b(B, tile_cap=4096):
    """Batch tile: multiple of 8, <= tile_cap, and an even number (>=2 when
    B > 8) of grid steps so v7x's two TensorCores split the work evenly."""
    b8 = _round_up(max(B, 1), 8)
    tb = min(b8, tile_cap)
    steps = _cdiv(b8, tb)
    if steps == 1:
        if b8 > 8:
            steps = 2          # give v7x's 2nd TC a tile (~0.35us extra on 1-TC chips)
    elif steps % 2 == 1:
        steps += 1             # even step count -> balanced across 2 TCs
    return _round_up(_cdiv(b8, steps), 8)


# ------------------------------ kernel ------------------------------

def _actor_critic_kernel(state_ref, w1_ref, b1_ref, w2_ref, b2_ref,
                         w3_ref, b3_ref, out_ref, *, act_dim, out_cols):
    x = state_ref[...]                                                # [TB, S] f32

    # layer 1: fused [S,128]; actor hidden -> lanes 0:64, critic -> lanes 64:128
    h = jnp.dot(x, w1_ref[...], preferred_element_type=jnp.float32) + b1_ref[...]
    h = jnp.maximum(h, 0.0)

    # layer 2: block-diagonal [128,128] keeps the two heads independent
    h = jnp.dot(h, w2_ref[...], preferred_element_type=jnp.float32) + b2_ref[...]
    h = jnp.maximum(h, 0.0)

    # layer 3: fused head -> [TB,128] slab
    #   cols 0:A -> mean, cols A:2A -> log_std (converted to std), col 2A -> value
    y = jnp.dot(h, w3_ref[...], preferred_element_type=jnp.float32) + b3_ref[...]

    # lane-only (1,128) mask broadcast over rows (cheaper than a [TB,128] iota)
    col = jax.lax.broadcasted_iota(jnp.int32, (1, y.shape[-1]), 1)
    is_log_std = (col >= act_dim) & (col < 2 * act_dim)
    # NOTE: clip BEFORE exp keeps the whole-vreg EUP exp finite on the
    # mean/value lanes (which are discarded by the where).
    std_all = jnp.exp(jnp.clip(y, -4.0, 1.0))
    y = jnp.where(is_log_std, std_all, y)

    if out_cols == y.shape[-1]:
        out_ref[...] = y                   # unmasked lane-dense 128-wide store
    else:
        out_ref[...] = y[:, :out_cols]     # narrow store: ~14x less HBM writeback


# ------------------------------ wrapper ------------------------------

def actor_critic_forward(state, packed, act_dim, *, tile_cap=4096,
                         narrow_out_min_batch=2048):
    """Fused actor-critic forward pass.

    state : [B, state_dim] float32
    packed: dict from pack_params() (fused [in,out] weights, [1,128] biases)
    Returns (mean [B, A], std [B, A], value [B, 1]).
    """
    state = jnp.asarray(state, jnp.float32)
    B, S = state.shape
    assert 2 * act_dim + 1 <= PACKED, "action_dim too large for 128-lane packing"

    tb = _pick_tile_b(B, tile_cap)
    b_pad = _round_up(B, tb)
    if b_pad != B:
        state = jnp.pad(state, ((0, b_pad - B), (0, 0)))

    # Large batches: write only the useful columns (mean|std|value), cutting
    # HBM writeback ~14x once per-step overhead is amortized. Small batches
    # keep the dense 128-lane unmasked store.
    useful = 2 * act_dim + 1
    out_cols = useful if B >= narrow_out_min_batch else PACKED

    resident = lambda i: (0, 0)   # weights/biases pinned in VMEM across steps

    slab = pl.pallas_call(
        functools.partial(_actor_critic_kernel, act_dim=act_dim, out_cols=out_cols),
        out_shape=jax.ShapeDtypeStruct((b_pad, out_cols), jnp.float32),
        grid=(b_pad // tb,),
        in_specs=[
            pl.BlockSpec((tb, S), lambda i: (i, 0)),        # state tile (pipelined)
            pl.BlockSpec((S, PACKED), resident),            # w1
            pl.BlockSpec((1, PACKED), resident),            # b1
            pl.BlockSpec((PACKED, PACKED), resident),       # w2 (block-diag)
            pl.BlockSpec((1, PACKED), resident),            # b2
            pl.BlockSpec((PACKED, PACKED), resident),       # w3 (packed head)
            pl.BlockSpec((1, PACKED), resident),            # b3
        ],
        out_specs=pl.BlockSpec((tb, out_cols), lambda i: (i, 0)),
        compiler_params=pltpu.CompilerParams(
            dimension_semantics=("parallel",),               # 2 TCs on v7x
            vmem_limit_bytes=32 * 1024 * 1024),              # safe headroom on v5e
    )(state, packed["w1"], packed["b1"], packed["w2"], packed["b2"],
      packed["w3"], packed["b3"])

    slab = slab[:B]
    mean = slab[:, :act_dim]
    std = slab[:, act_dim:2 * act_dim]
    value = slab[:, 2 * act_dim:2 * act_dim + 1]
    return mean, std, value


# ----------------------- parameter construction -----------------------

def _orthogonal(key, out_dim, in_dim, gain):
    """Orthogonal init (like nn.init.orthogonal_) for a [out, in] weight,
    returned pre-transposed as [in, out]."""
    rows, cols = out_dim, in_dim
    flat = jax.random.normal(key, (max(rows, cols), min(rows, cols)), jnp.float32)
    q, r = jnp.linalg.qr(flat)
    q = q * jnp.sign(jnp.diag(r))
    if rows < cols:
        q = q.T
    w = gain * q[:rows, :cols]            # [out, in]
    return jnp.asarray(w.T, jnp.float32)  # [in, out]


def init_params(key, state_dim, action_dim):
    """Per-layer params mirroring the PyTorch module (weights pre-transposed)."""
    gain = float(np.sqrt(2.0))
    ks = jax.random.split(key, 6)
    return {
        # actor
        "aw1": _orthogonal(ks[0], HIDDEN, state_dim, gain),
        "ab1": jnp.zeros((1, HIDDEN), jnp.float32),
        "aw2": _orthogonal(ks[1], HIDDEN, HIDDEN, gain),
        "ab2": jnp.zeros((1, HIDDEN), jnp.float32),
        "aw3": _orthogonal(ks[2], action_dim * 2, HIDDEN, gain),
        "ab3": jnp.zeros((1, action_dim * 2), jnp.float32),
        # critic
        "cw1": _orthogonal(ks[3], HIDDEN, state_dim, gain),
        "cb1": jnp.zeros((1, HIDDEN), jnp.float32),
        "cw2": _orthogonal(ks[4], HIDDEN, HIDDEN, gain),
        "cb2": jnp.zeros((1, HIDDEN), jnp.float32),
        "cw3": _orthogonal(ks[5], 1, HIDDEN, gain),
        "cb3": jnp.zeros((1, 1), jnp.float32),
    }


def pack_params(p, act_dim):
    """Fuse actor+critic layer params into 128-lane-wide weights/biases."""
    w1 = jnp.concatenate([p["aw1"], p["cw1"]], axis=1)           # [S, 128]
    b1 = jnp.concatenate([p["ab1"], p["cb1"]], axis=1)           # [1, 128]

    w2 = jnp.zeros((PACKED, PACKED), jnp.float32)                # block-diagonal
    w2 = w2.at[:HIDDEN, :HIDDEN].set(p["aw2"])
    w2 = w2.at[HIDDEN:, HIDDEN:].set(p["cw2"])
    b2 = jnp.concatenate([p["ab2"], p["cb2"]], axis=1)

    w3 = jnp.zeros((PACKED, PACKED), jnp.float32)                # packed head
    w3 = w3.at[:HIDDEN, :2 * act_dim].set(p["aw3"])              # mean | log_std
    w3 = w3.at[HIDDEN:, 2 * act_dim].set(p["cw3"][:, 0])         # value column
    b3 = jnp.zeros((1, PACKED), jnp.float32)
    b3 = b3.at[0, :2 * act_dim].set(p["ab3"][0])
    b3 = b3.at[0, 2 * act_dim].set(p["cb3"][0, 0])

    return {"w1": w1, "b1": b1, "w2": w2, "b2": b2, "w3": w3, "b3": b3}


def _reference_forward(state, p):
    """Pure-JAX reference mirroring the PyTorch module (unfused params)."""
    h = jnp.maximum(state @ p["aw1"] + p["ab1"], 0.0)
    h = jnp.maximum(h @ p["aw2"] + p["ab2"], 0.0)
    out = h @ p["aw3"] + p["ab3"]
    a = out.shape[-1] // 2
    mean, log_std = out[:, :a], out[:, a:]
    std = jnp.exp(jnp.clip(log_std, -4.0, 1.0))
    v = jnp.maximum(state @ p["cw1"] + p["cb1"], 0.0)
    v = jnp.maximum(v @ p["cw2"] + p["cb2"], 0.0)
    value = v @ p["cw3"] + p["cb3"]
    return mean, std, value


if __name__ == "__main__":
    key = jax.random.PRNGKey(0)
    k_param, k_state = jax.random.split(key)

    state_dim, action_dim = 16, 4
    params = init_params(k_param, state_dim, action_dim)
    packed = pack_params(params, action_dim)

    # --- small batch: dense 128-lane output slab, single grid step ---
    batch = 8
    state = jax.random.normal(k_state, (batch, state_dim), jnp.float32)
    mean, std, value = jax.block_until_ready(
        actor_critic_forward(state, packed, action_dim))

    r_mean, r_std, r_value = _reference_forward(state, params)
    np.testing.assert_allclose(np.asarray(mean), np.asarray(r_mean), rtol=1e-5, atol=1e-5)
    np.testing.assert_allclose(np.asarray(std), np.asarray(r_std), rtol=1e-5, atol=1e-5)
    np.testing.assert_allclose(np.asarray(value), np.asarray(r_value), rtol=1e-5, atol=1e-5)
    assert mean.shape == (batch, action_dim)
    assert std.shape == (batch, action_dim)
    assert value.shape == (batch, 1)

    # --- slightly larger batch: exercises the narrow-output path and the
    #     even 2-step grid (v7x 2-TC sharding) with padded batch rows ---
    batch2 = 40
    state2 = jax.random.normal(jax.random.PRNGKey(1), (batch2, state_dim), jnp.float32)
    mean2, std2, value2 = jax.block_until_ready(
        actor_critic_forward(state2, packed, action_dim, narrow_out_min_batch=1))

    r_mean2, r_std2, r_value2 = _reference_forward(state2, params)
    np.testing.assert_allclose(np.asarray(mean2), np.asarray(r_mean2), rtol=1e-5, atol=1e-5)
    np.testing.assert_allclose(np.asarray(std2), np.asarray(r_std2), rtol=1e-5, atol=1e-5)
    np.testing.assert_allclose(np.asarray(value2), np.asarray(r_value2), rtol=1e-5, atol=1e-5)
    assert mean2.shape == (batch2, action_dim)
    assert std2.shape == (batch2, action_dim)
    assert value2.shape == (batch2, 1)

    print("KERNEL_OK")
</pallas_src>

<mosaic_0001>
module attributes {stable_mosaic.version = 11 : i64} {
  func.func @_actor_critic_kernel(%arg0: i32, %arg1: memref<8x16xf32, #tpu.memory_space<vmem>>, %arg2: memref<16x128xf32, #tpu.memory_space<vmem>>, %arg3: memref<1x128xf32, #tpu.memory_space<vmem>>, %arg4: memref<128x128xf32, #tpu.memory_space<vmem>>, %arg5: memref<1x128xf32, #tpu.memory_space<vmem>>, %arg6: memref<128x128xf32, #tpu.memory_space<vmem>>, %arg7: memref<1x128xf32, #tpu.memory_space<vmem>>, %arg8: memref<8x128xf32, #tpu.memory_space<vmem>>) attributes {dimension_semantics = [#tpu.dimension_semantics<parallel>], iteration_bounds = array<i64: 1>, scalar_prefetch = 0 : i64, scratch_operands = 0 : i64, tpu.core_type = #tpu.core_type<tc>, window_params = [{transform_indices = @transform_0, window_bounds = array<i64: 8, 16>}, {pipeline_mode = #tpu.pipeline_mode<synchronous>, transform_indices = @transform_1, window_bounds = array<i64: 16, 128>}, {pipeline_mode = #tpu.pipeline_mode<synchronous>, transform_indices = @transform_2, window_bounds = array<i64: 1, 128>}, {pipeline_mode = #tpu.pipeline_mode<synchronous>, transform_indices = @transform_3, window_bounds = array<i64: 128, 128>}, {pipeline_mode = #tpu.pipeline_mode<synchronous>, transform_indices = @transform_4, window_bounds = array<i64: 1, 128>}, {pipeline_mode = #tpu.pipeline_mode<synchronous>, transform_indices = @transform_5, window_bounds = array<i64: 128, 128>}, {pipeline_mode = #tpu.pipeline_mode<synchronous>, transform_indices = @transform_6, window_bounds = array<i64: 1, 128>}, {transform_indices = @transform_7, window_bounds = array<i64: 8, 128>}]} {
    %c0 = arith.constant 0 : index
    %c0_0 = arith.constant 0 : index
    %0 = vector.load %arg1[%c0, %c0_0] : memref<8x16xf32, #tpu.memory_space<vmem>>, vector<8x16xf32>
    %c0_1 = arith.constant 0 : index
    %c0_2 = arith.constant 0 : index
    %1 = vector.load %arg2[%c0_1, %c0_2] : memref<16x128xf32, #tpu.memory_space<vmem>>, vector<16x128xf32>
    %cst = arith.constant dense<0.000000e+00> : vector<8x128xf32>
    %2 = tpu.matmul %0, %1, %cst {dimension_numbers = #tpu.dot_dimension_numbers<[1], [0], [0], [1], [0, 0, 1, 1], [], []>} : vector<8x16xf32>, vector<16x128xf32>, vector<8x128xf32> -> vector<8x128xf32>
    %c0_3 = arith.constant 0 : index
    %c0_4 = arith.constant 0 : index
    %3 = vector.load %arg3[%c0_3, %c0_4] : memref<1x128xf32, #tpu.memory_space<vmem>>, vector<1x128xf32>
    %4 = vector.broadcast %3 : vector<1x128xf32> to vector<8x128xf32>
    %5 = arith.addf %2, %4 : vector<8x128xf32>
    %cst_5 = arith.constant 0.000000e+00 : f32
    %6 = vector.broadcast %cst_5 : f32 to vector<8x128xf32>
    %7 = arith.maximumf %5, %6 : vector<8x128xf32>
    %c0_6 = arith.constant 0 : index
    %c0_7 = arith.constant 0 : index
    %8 = vector.load %arg4[%c0_6, %c0_7] : memref<128x128xf32, #tpu.memory_space<vmem>>, vector<128x128xf32>
    %cst_8 = arith.constant dense<0.000000e+00> : vector<8x128xf32>
    %9 = tpu.matmul %7, %8, %cst_8 {dimension_numbers = #tpu.dot_dimension_numbers<[1], [0], [0], [1], [0, 0, 1, 1], [], []>} : vector<8x128xf32>, vector<128x128xf32>, vector<8x128xf32> -> vector<8x128xf32>
    %c0_9 = arith.constant 0 : index
    %c0_10 = arith.constant 0 : index
    %10 = vector.load %arg5[%c0_9, %c0_10] : memref<1x128xf32, #tpu.memory_space<vmem>>, vector<1x128xf32>
    %11 = vector.broadcast %10 : vector<1x128xf32> to vector<8x128xf32>
    %12 = arith.addf %9, %11 : vector<8x128xf32>
    %cst_11 = arith.constant 0.000000e+00 : f32
    %13 = vector.broadcast %cst_11 : f32 to vector<8x128xf32>
    %14 = arith.maximumf %12, %13 : vector<8x128xf32>
    %c0_12 = arith.constant 0 : index
    %c0_13 = arith.constant 0 : index
    %15 = vector.load %arg6[%c0_12, %c0_13] : memref<128x128xf32, #tpu.memory_space<vmem>>, vector<128x128xf32>
    %cst_14 = arith.constant dense<0.000000e+00> : vector<8x128xf32>
    %16 = tpu.matmul %14, %15, %cst_14 {dimension_numbers = #tpu.dot_dimension_numbers<[1], [0], [0], [1], [0, 0, 1, 1], [], []>} : vector<8x128xf32>, vector<128x128xf32>, vector<8x128xf32> -> vector<8x128xf32>
    %c0_15 = arith.constant 0 : index
    %c0_16 = arith.constant 0 : index
    %17 = vector.load %arg7[%c0_15, %c0_16] : memref<1x128xf32, #tpu.memory_space<vmem>>, vector<1x128xf32>
    %18 = vector.broadcast %17 : vector<1x128xf32> to vector<8x128xf32>
    %19 = arith.addf %16, %18 : vector<8x128xf32>
    %20 = tpu.iota {dimensions = array<i32: 1>} : vector<1x128xi32>
    %c4_i32 = arith.constant 4 : i32
    %21 = vector.broadcast %c4_i32 : i32 to vector<1x128xi32>
    %22 = arith.cmpi sge, %20, %21 : vector<1x128xi32>
    %c8_i32 = arith.constant 8 : i32
    %23 = vector.broadcast %c8_i32 : i32 to vector<1x128xi32>
    %24 = arith.cmpi slt, %20, %23 : vector<1x128xi32>
    %25 = arith.andi %22, %24 : vector<1x128xi1>
    %cst_17 = arith.constant -4.000000e+00 : f32
    %cst_18 = arith.constant 1.000000e+00 : f32
    %26 = vector.broadcast %cst_17 : f32 to vector<8x128xf32>
    %27 = arith.maximumf %26, %19 : vector<8x128xf32>
    %28 = vector.broadcast %cst_18 : f32 to vector<8x128xf32>
    %29 = arith.minimumf %28, %27 : vector<8x128xf32>
    %30 = math.exp %29 : vector<8x128xf32>
    %31 = vector.shape_cast %25 : vector<1x128xi1> to vector<1x128xi1>
    %32 = vector.broadcast %31 : vector<1x128xi1> to vector<8x128xi1>
    %33 = arith.select %32, %30, %19 : vector<8x128xi1>, vector<8x128xf32>
    %c0_19 = arith.constant 0 : index
    %c0_20 = arith.constant 0 : index
    %34 = vector.load %arg8[%c0_19, %c0_20] : memref<8x128xf32, #tpu.memory_space<vmem>>, vector<8x128xf32>
    tpu.vector_store %arg8[%c0_19, %c0_20], %33 {strides = array<i32>} : memref<8x128xf32, #tpu.memory_space<vmem>>, vector<8x128xf32>,
    return
  }
  func.func @transform_0(%arg0: i32) -> (i32, i32) {
    %c0_i32 = arith.constant 0 : i32
    %c0_i32_0 = arith.constant 0 : i32
    return %arg0, %c0_i32 : i32, i32
  }
  func.func @transform_1(%arg0: i32) -> (i32, i32) {
    %c0_i32 = arith.constant 0 : i32
    %c0_i32_0 = arith.constant 0 : i32
    %c0_i32_1 = arith.constant 0 : i32
    return %c0_i32, %c0_i32_0 : i32, i32
  }
  func.func @transform_2(%arg0: i32) -> (i32, i32) {
    %c0_i32 = arith.constant 0 : i32
    %c0_i32_0 = arith.constant 0 : i32
    %c0_i32_1 = arith.constant 0 : i32
    return %c0_i32, %c0_i32_0 : i32, i32
  }
  func.func @transform_3(%arg0: i32) -> (i32, i32) {
    %c0_i32 = arith.constant 0 : i32
    %c0_i32_0 = arith.constant 0 : i32
    %c0_i32_1 = arith.constant 0 : i32
    return %c0_i32, %c0_i32_0 : i32, i32
  }
  func.func @transform_4(%arg0: i32) -> (i32, i32) {
    %c0_i32 = arith.constant 0 : i32
    %c0_i32_0 = arith.constant 0 : i32
    %c0_i32_1 = arith.constant 0 : i32
    return %c0_i32, %c0_i32_0 : i32, i32
  }
  func.func @transform_5(%arg0: i32) -> (i32, i32) {
    %c0_i32 = arith.constant 0 : i32
    %c0_i32_0 = arith.constant 0 : i32
    %c0_i32_1 = arith.constant 0 : i32
    return %c0_i32, %c0_i32_0 : i32, i32
  }
  func.func @transform_6(%arg0: i32) -> (i32, i32) {
    %c0_i32 = arith.constant 0 : i32
    %c0_i32_0 = arith.constant 0 : i32
    %c0_i32_1 = arith.constant 0 : i32
    return %c0_i32, %c0_i32_0 : i32, i32
  }
  func.func @transform_7(%arg0: i32) -> (i32, i32) {
    %c0_i32 = arith.constant 0 : i32
    %c0_i32_0 = arith.constant 0 : i32
    return %arg0, %c0_i32 : i32, i32
  }
}

</mosaic_0001>

<bundles_post_ra>
// kernel: tpu_custom_call.1
= control target key start
LH: loop header
LB: loop body
LE: loop exit
PB: predicated region body
PF: predicated region fallthrough
CT: control target
= control target key end

     0   :  { %12 = vsyncpa [#allocation3], 0  ;;  %s445_s0 = inlined_call_operand.hbm [shape: f32[8,16], index: 0, kind: input, shape index: {}]   ;;  %s446_s1 = inlined_call_operand.hbm [shape: f32[16,128], index: 1, kind: input, shape index: {}]   ;;  %s447_s2 = inlined_call_operand.vmem [shape: f32[1,128], index: 2, kind: input, shape index: {}]   ;;  %s448_s3 = inlined_call_operand.hbm [shape: f32[128,128], index: 3, kind: input, shape index: {}]   ;;  %s449_s4 = inlined_call_operand.vmem [shape: f32[1,128], index: 4, kind: input, shape index: {}]   ;;  %s450_s5 = inlined_call_operand.hbm [shape: f32[128,128], index: 5, kind: input, shape index: {}]   ;;  %s451_s6 = inlined_call_operand.vmem [shape: f32[1,128], index: 6, kind: input, shape index: {}]   ;;  %s452_s7 = inlined_call_operand.hbm [shape: f32[8,128], index: 7, kind: output, shape index: {}]  }
   0x1   :  { %13 = vsyncpa [#allocation6], 0 }
   0x2   :  { %14 = vsyncpa [#allocation9], 0  ;;  %s31_s26 = sshll.u32 %s446_s1, 4  ;;  %s32_s26 = int_to_ptr.hbm [resolvable:$true] %s31_s26 }
   0x3   :  { %15 = vsyncpa [#allocation4], 0  ;;  %s374_s27 = smov [#allocation5]   ;;  %s21_s8 = sshll.u32 %s445_s0, 4  ;;  %s22_s8 = int_to_ptr.hbm [resolvable:$true] %s21_s8 }
   0x4   :  { %s33_s28 = sshll.u32 %s374_s27, 4  ;;  %s375_s9 = smov 128   ;;  %s34_s28 = int_to_ptr.vmem [resolvable:$true] %s33_s28 }
   0x5   :  { %s376_s10 = smov 8   ;;  %s377_s11 = smov [#allocation2]  }
   0x6   :  { %39 = dma.hbm_to_vmem [thread:$0]  %s32_s26, 256, %s34_s28, [#allocation6], %s375_s9, %s375_s9, %s376_s10  }
   0x7   :  { %s23_s12 = sshll.u32 %s377_s11, 4  ;;  %s46_s15 = sshll.u32 %s448_s3, 4  ;;  %s24_s12 = int_to_ptr.vmem [resolvable:$true] %s23_s12  ;;  %s47_s15 = int_to_ptr.hbm [resolvable:$true] %s46_s15 }
   0x8   :  { %26 = dma.hbm_to_vmem [thread:$0]  %s22_s8, 128, %s24_s12, [#allocation3]  }
   0x9   :  { %s61_s17 = sshll.u32 %s450_s5, 4  ;;  %s378_s18 = smov [#allocation7]   ;;  %s62_s17 = int_to_ptr.hbm [resolvable:$true] %s61_s17 }
   0xa   :  { %s48_s19 = sshll.u32 %s378_s18, 4  ;;  %s379_s0 = smov [#allocation8]   ;;  %s49_s19 = int_to_ptr.vmem [resolvable:$true] %s48_s19 }
   0xb   :  { %54 = dma.hbm_to_vmem [thread:$0]  %s47_s15, 2048, %s49_s19, [#allocation6], %s375_s9, %s375_s9, %s376_s10  }
   0xc   :  { %s63_s20 = sshll.u32 %s379_s0, 4  ;;  %s64_s20 = int_to_ptr.vmem [resolvable:$true] %s63_s20 }
   0xd   :  { %69 = dma.hbm_to_vmem [thread:$0]  %s62_s17, 2048, %s64_s20, [#allocation9], %s375_s9, %s375_s9, %s376_s10  }
   0xe   :  { %366 = dma.done.wait [#allocation3], 128  }
   0xf   :  { %367 = vsyncadd [#allocation3], 4294967168 }
  0x10   :  { %368 = dma.done.wait [#allocation6], 2304  }
  0x11   :  { %369 = vsyncadd [#allocation6], 4294964992 }
  0x12   :  { %370 = dma.done.wait [#allocation9], 2048  }
  0x13   :  { %371 = vsyncadd [#allocation9], 4294965248  ;;  %v90_v0 = vld [vmem:[#allocation5 + $0x8] sm:$0xff]  ;;  %v89_v1 = vld [vmem:[#allocation5] sm:$0xff]  ;;  %vm95_vm0 = vcmask 130048   ;;  %v201_v46 = vlaneseq  ;;  %s380_s24 = smov [#allocation10]  }
  0x14   :  { %113 = vmatpush.msra.mxu0 %v90_v0  ;;  %v88_v2 = vld [vmem:[#allocation2] sm:$0xff]  ;;  %v135_v3 = vld [vmem:[#allocation7 + $0x78] sm:$0xff]  ;;  %v134_v4 = vld [vmem:[#allocation7 + $0x70] sm:$0xff]  ;;  %s221_s27 = sshll.u32 %s452_s7, 4  ;;  %s222_s27 = int_to_ptr.hbm [resolvable:$true] %s221_s27 }
  0x15   :  { %140 = vmatpush.msra.mxu1 %v135_v3  ;;  %v133_v5 = vld [vmem:[#allocation7 + $0x68] sm:$0xff]  ;;  %v132_v6 = vld [vmem:[#allocation7 + $0x60] sm:$0xff]  ;;  %v131_v7 = vld [vmem:[#allocation7 + $0x58] sm:$0xff]  ;;  %v202_v49 = vand.u32 127, %v201_v46 }
  0x16   :  { %114 = vmatpush.msra.mxu0 %v89_v1  ;;  %v130_v8 = vld [vmem:[#allocation7 + $0x50] sm:$0xff]  ;;  %v129_v9 = vld [vmem:[#allocation7 + $0x48] sm:$0xff]  ;;  %v128_v10 = vld [vmem:[#allocation7 + $0x40] sm:$0xff] }
  0x17   :  { %233 = vmatmul.msk.f32.vlgmr.msra.gmra.mxu0 %vm95_vm0, %v88_v2  ;;  %141 = vmatpush.msra.mxu1 %v134_v4  ;;  %v127_v11 = vld [vmem:[#allocation7 + $0x38] sm:$0xff]  ;;  %v126_v12 = vld [vmem:[#allocation7 + $0x30] sm:$0xff]  ;;  %v125_v13 = vld [vmem:[#allocation7 + $0x28] sm:$0xff]  ;;  %vm203_vm1 = vcmp.ge.s32.totalorder %v202_v49, 4  ;;  %vm204_vm2 = vcmp.lt.s32.totalorder %v202_v49, 8 }
  0x18   :  { %v124_v14 = vld [vmem:[#allocation7 + $0x20] sm:$0xff]  ;;  %v123_v15 = vld [vmem:[#allocation7 + $0x18] sm:$0xff]  ;;  %v122_v16 = vld [vmem:[#allocation7 + $0x10] sm:$0xff] }
  0x19   :  { %142 = vmatpush.msra.mxu1 %v133_v5  ;;  %v121_v17 = vld [vmem:[#allocation7 + $0x8] sm:$0xff]  ;;  %v120_v18 = vld [vmem:[#allocation7] sm:$0xff]  ;;  %v176_v19 = vld [vmem:[#allocation8 + $0x78] sm:$0xff] }
  0x1a   :  { %v175_v20 = vld [vmem:[#allocation8 + $0x70] sm:$0xff]  ;;  %181 = vmatpush.msra.mxu2 %v176_v19  ;;  %v174_v21 = vld [vmem:[#allocation8 + $0x68] sm:$0xff]  ;;  %v173_v22 = vld [vmem:[#allocation8 + $0x60] sm:$0xff] }
  0x1b   :  { %143 = vmatpush.msra.mxu1 %v132_v6  ;;  %v172_v23 = vld [vmem:[#allocation8 + $0x58] sm:$0xff]  ;;  %v171_v24 = vld [vmem:[#allocation8 + $0x50] sm:$0xff]  ;;  %v170_v25 = vld [vmem:[#allocation8 + $0x48] sm:$0xff] }
  0x1c   :  { %182 = vmatpush.msra.mxu2 %v175_v20  ;;  %v169_v26 = vld [vmem:[#allocation8 + $0x40] sm:$0xff]  ;;  %v168_v27 = vld [vmem:[#allocation8 + $0x38] sm:$0xff]  ;;  %v167_v28 = vld [vmem:[#allocation8 + $0x30] sm:$0xff] }
  0x1d   :  { %144 = vmatpush.msra.mxu1 %v131_v7  ;;  %v166_v29 = vld [vmem:[#allocation8 + $0x28] sm:$0xff]  ;;  %v165_v30 = vld [vmem:[#allocation8 + $0x20] sm:$0xff]  ;;  %v164_v31 = vld [vmem:[#allocation8 + $0x18] sm:$0xff] }
  0x1e   :  { %183 = vmatpush.msra.mxu2 %v174_v21  ;;  %v241_v32 = vld [vmem:[%s447_s2] ss:$0 sm:$0xff]  ;;  %v163_v36 = vld [vmem:[#allocation8 + $0x10] sm:$0xff]  ;;  %v161_v38 = vld [vmem:[#allocation8] sm:$0xff] }
  0x1f   :  { %145 = vmatpush.msra.mxu1 %v130_v8  ;;  %v162_v37 = vld [vmem:[#allocation8 + $0x8] sm:$0xff]  ;;  %vm205_vm3 = vmand %vm203_vm1, %vm204_vm2 }
  0x20   :  { %184 = vmatpush.msra.mxu2 %v173_v22  ;;  %v242_v39 = vld [vmem:[%s449_s4] ss:$0 sm:$0xff]  ;;  %s219_s4 = sshll.u32 %s380_s24, 4  ;;  %s220_s4 = int_to_ptr.vmem [resolvable:$true] %s219_s4 }
  0x21   :  { %146 = vmatpush.msra.mxu1 %v129_v9  ;;  %v243_v43 = vld [vmem:[%s451_s6] ss:$0 sm:$0xff] }
  0x22   :  { %185 = vmatpush.msra.mxu2 %v172_v23 }
  0x23   :  { %147 = vmatpush.msra.mxu1 %v128_v10 }
  0x24   :  { %186 = vmatpush.msra.mxu2 %v171_v24 }
  0x25   :  { %148 = vmatpush.msra.mxu1 %v127_v11 }
  0x26   :  { %187 = vmatpush.msra.mxu2 %v170_v25 }
  0x27   :  { %149 = vmatpush.msra.mxu1 %v126_v12 }
  0x28   :  { %188 = vmatpush.msra.mxu2 %v169_v26 }
  0x29   :  { %150 = vmatpush.msra.mxu1 %v125_v13 }
  0x2a   :  { %189 = vmatpush.msra.mxu2 %v168_v27 }
  0x2b   :  { %151 = vmatpush.msra.mxu1 %v124_v14 }
  0x2c   :  { %190 = vmatpush.msra.mxu2 %v167_v28 }
  0x2d   :  { %152 = vmatpush.msra.mxu1 %v123_v15 }
  0x2e   :  { %191 = vmatpush.msra.mxu2 %v166_v29 }
  0x2f   :  { %153 = vmatpush.msra.mxu1 %v122_v16 }
  0x30   :  { %192 = vmatpush.msra.mxu2 %v165_v30 }
  0x31   :  { %154 = vmatpush.msra.mxu1 %v121_v17 }
  0x32   :  { %193 = vmatpush.msra.mxu2 %v164_v31 }
  0x33   :  { %155 = vmatpush.msra.mxu1 %v120_v18 }
  0x34   :  { %194 = vmatpush.msra.mxu2 %v163_v36 }
  0x36   :  { %195 = vmatpush.msra.mxu2 %v162_v37 }
  0x38   :  { %196 = vmatpush.msra.mxu2 %v161_v38 }
  0x94   :  { %v116_v33 = vpop.f32.mrf.mxu0 }
  0x95   :  { %v117_v34 = vadd.f32 %v241_v32, %v116_v33 }
  0x97   :  { %v119_v35 = vmax.f32 %v117_v34, 0.0 }
  0x99   :  { %156 = vmatmul.f32.vlgmr.msra.gmra.mxu1 %v119_v35 }
 0x116   :  { %v157_v40 = vpop.f32.mrf.mxu1 }
 0x117   :  { %v158_v41 = vadd.f32 %v242_v39, %v157_v40 }
 0x119   :  { %v160_v42 = vmax.f32 %v158_v41, 0.0 }
 0x11b   :  { %197 = vmatmul.f32.vlgmr.msra.gmra.mxu2 %v160_v42 }
 0x19e   :  { %v198_v44 = vpop.f32.mrf.mxu2 }
 0x19f   :  { %v199_v45 = vadd.f32 %v243_v43, %v198_v44 }
 0x1a1   :  { %v206_v47 = vmax.f32 %v199_v45, -4.0 }
 0x1a3   :  { %v207_v48 = vmin.f32 %v206_v47, 1.0 }
 0x1a5   :  { %v208_v50 = vmul.f32 1.442695, %v207_v48 }
 0x1a7   :  { %244 = vpow2.f32 %v208_v50 }
 0x1ad   :  { %v245_v51 = vpop.eup %244 }
 0x1ae   :  { %v212_v52 = vsel %vm205_vm3, %v245_v51, %v199_v45 }
 0x1af   :  { %213 = vst [vmem:[#allocation10] sm:$0xff] %v212_v52 }
 0x1b0   :  { %224 = dma.vmem_to_hbm [thread:$0]  %s220_s4, 128, %s222_s27, [#allocation4]  }
 0x1b1   :  { %372 = dma.done.wait [#allocation4], 128  }
 0x1b2   :  { %373 = vsyncadd [#allocation4], 4294967168 }
 0x1b3   :  { %229 = vsyncpa [#allocation3], 1 }
 0x1b4   :  { %230 = vsyncpa [#allocation6], 1 }
 0x1b5   :  { %231 = vsyncpa [#allocation9], 1 }
 0x1b6   :  { %232 = vsyncpa [#allocation4], 1 }

</bundles_post_ra>
